<compile_context>
chip_gen: v5e
topology: v5e:2x2
jax: 0.10.0
libtpu: 0.0.40
codegen_flags: <defaults>
</compile_context>

<pallas_src>
import math

import jax
import jax.numpy as jnp
from jax.experimental import pallas as pl
from jax.experimental.pallas import tpu as pltpu

# ---------------------------------------------------------------------------
# MaxPool2d geometry (kernel_size=3, stride=3 (=kernel), padding=0, ceil_mode)
# ---------------------------------------------------------------------------
KERNEL = 3
STRIDE = 3  # nn.MaxPool2d default: stride == kernel_size

DEFAULT_TILE_NC = 8192   # channel cap per grid step (f32: ~4 MiB/buffer lane-padded)
_PALLAS_MIN_NC = 128     # below this a pallas_call is pure launch overhead


def _pool_out_size(in_size: int, k: int, s: int, ceil_mode: bool) -> int:
    if ceil_mode:
        out = math.ceil((in_size - k) / s) + 1
        # PyTorch rule: last window must start inside the input (padding == 0 here)
        if (out - 1) * s >= in_size:
            out -= 1
    else:
        out = (in_size - k) // s + 1
    return out


def _round_up(x: int, m: int) -> int:
    return ((x + m - 1) // m) * m


def _choose_tile(nc: int, tile_cap: int) -> int:
    """Tile the NC axis: multiples of 128 (lane-dense output blocks), >= 4 grid
    steps when possible (2 blocks per TensorCore on v7x megacore), capped so the
    double-buffered, lane-padded (tile, 128) f32 input blocks stay well inside
    the default 32 MiB scoped-VMEM limit on v5e/v6e/v7x."""
    cap = max(128, _round_up(min(tile_cap, DEFAULT_TILE_NC), 128))
    target = _round_up(pl.cdiv(nc, 4), 128)
    return max(128, min(cap, target))


# ---------------------------------------------------------------------------
# Fused kernel: NCHW-contiguous (TILE, H*W) block -> lane-dense (OH*OW, TILE)
# ---------------------------------------------------------------------------
def _make_fused_kernel(H, W, OH, OW):
    def kernel(x_ref, o_ref):
        # x_ref: (TILE, H*W) straight from the NCHW-contiguous buffer.
        # One XLU relayout so channels sit on the lane axis; everything after
        # is sublane-range maxes (VPU) and the output block is a lane-dense
        # (OH*OW, TILE) slab -> full-width unmasked HBM writeback.
        x = jnp.transpose(x_ref[...], (1, 0))                     # (H*W, TILE)
        for oh in range(OH):
            h0 = oh * STRIDE
            h1 = min(h0 + KERNEL, H)                              # ceil_mode clip
            for ow in range(OW):
                w0 = ow * STRIDE
                w1 = min(w0 + KERNEL, W)                          # ceil_mode clip
                # Stage 1: per image row, max over the contiguous window cols.
                m = jnp.max(x[h0 * W + w0:h0 * W + w1, :], axis=0, keepdims=True)
                # Stage 2: max across the window's rows.
                for h in range(h0 + 1, h1):
                    m = jnp.maximum(
                        m, jnp.max(x[h * W + w0:h * W + w1, :], axis=0, keepdims=True))
                r = oh * OW + ow
                o_ref[r:r + 1, :] = m                             # (1, TILE) row store

    return kernel


# ---------------------------------------------------------------------------
# Pure-jnp reference / small-problem path
# ---------------------------------------------------------------------------
def _maxpool_ref_nchw(x):
    N, C, H, W = x.shape
    OH = _pool_out_size(H, KERNEL, STRIDE, True)
    OW = _pool_out_size(W, KERNEL, STRIDE, True)
    rows = []
    for oh in range(OH):
        h0 = oh * STRIDE
        h1 = min(h0 + KERNEL, H)
        cols = []
        for ow in range(OW):
            w0 = ow * STRIDE
            w1 = min(w0 + KERNEL, W)
            cols.append(jnp.max(x[:, :, h0:h1, w0:w1], axis=(2, 3)))
        rows.append(jnp.stack(cols, axis=-1))
    return jnp.stack(rows, axis=-2)


# ---------------------------------------------------------------------------
# Public entry point
# ---------------------------------------------------------------------------
def maxpool2d_ceil(x_nchw: jax.Array, *, tile_nc: int = DEFAULT_TILE_NC) -> jax.Array:
    """MaxPool2d(kernel_size=3, ceil_mode=True) on an NCHW tensor."""
    N, C, H, W = x_nchw.shape
    NC = N * C
    HW = H * W
    OH = _pool_out_size(H, KERNEL, STRIDE, True)
    OW = _pool_out_size(W, KERNEL, STRIDE, True)
    OHW = OH * OW

    # Tiny problems: a Pallas launch is pure overhead -> let XLA fuse it.
    if NC < _PALLAS_MIN_NC:
        return _maxpool_ref_nchw(x_nchw)

    # NCHW -> (NC, H*W) is a free row-major view (no data movement).
    x2d = x_nchw.reshape(NC, HW)
    tile = _choose_tile(NC, tile_nc)

    out_t = pl.pallas_call(
        _make_fused_kernel(H, W, OH, OW),
        out_shape=jax.ShapeDtypeStruct((OHW, NC), x2d.dtype),     # lane-dense output
        grid=(pl.cdiv(NC, tile),),
        in_specs=[pl.BlockSpec((tile, HW), lambda i: (i, 0))],
        out_specs=pl.BlockSpec((OHW, tile), lambda i: (0, i)),
        compiler_params=pltpu.CompilerParams(dimension_semantics=("parallel",)),
    )(x2d)                                                        # (OH*OW, NC)

    # Tiny (OH*OW, NC) -> (NC, OH*OW) relayout, then view as NCHW output.
    return jnp.transpose(out_t, (1, 0)).reshape(N, C, OH, OW)


class DemoPallas:
    """JAX/Pallas equivalent of the PyTorch `Demo` module (MaxPool2d k=3, ceil_mode)."""

    def __call__(self, x_nchw: jax.Array) -> jax.Array:
        return maxpool2d_ceil(x_nchw)


# ---------------------------------------------------------------------------
# Demo / self-test
# ---------------------------------------------------------------------------
if __name__ == "__main__":
    key = jax.random.PRNGKey(0)
    k_small, k_large = jax.random.split(key)

    model = DemoPallas()

    # 1) Module-spec demo shape: `torch.reshape(input, (-1, 1, 5, 5))`, small batch.
    x_small = jax.random.normal(k_small, (4 * 1 * 5 * 5,), dtype=jnp.float32)
    x_small = jnp.reshape(x_small, (-1, 1, 5, 5))                  # (4, 1, 5, 5)

    # 2) Larger batch so the fused Pallas kernel runs on a 4-step "parallel" grid.
    x_large = jax.random.normal(k_large, (512 * 1 * 5 * 5,), dtype=jnp.float32)
    x_large = jnp.reshape(x_large, (-1, 1, 5, 5))                  # (512, 1, 5, 5)

    out_small = model(x_small)                 # NC < 128 -> plain-jnp path
    out_large = model(x_large)                 # Pallas fused kernel, grid=(4,), tile=128
    jax.block_until_ready((out_small, out_large))

    ref_small = _maxpool_ref_nchw(x_small)
    ref_large = _maxpool_ref_nchw(x_large)

    assert out_small.shape == (4, 1, 2, 2), out_small.shape
    assert out_large.shape == (512, 1, 2, 2), out_large.shape
    assert jnp.allclose(out_small, ref_small), "small path mismatch"
    assert jnp.allclose(out_large, ref_large), "Pallas path mismatch"

    print("KERNEL_OK")
</pallas_src>

<mosaic_0001>
module attributes {stable_mosaic.version = 11 : i64} {
  func.func @kernel(%arg0: i32, %arg1: memref<128x25xf32, #tpu.memory_space<vmem>>, %arg2: memref<4x128xf32, #tpu.memory_space<vmem>>) attributes {dimension_semantics = [#tpu.dimension_semantics<parallel>], iteration_bounds = array<i64: 4>, scalar_prefetch = 0 : i64, scratch_operands = 0 : i64, tpu.core_type = #tpu.core_type<tc>, window_params = [{transform_indices = @transform_0, window_bounds = array<i64: 128, 25>}, {transform_indices = @transform_1, window_bounds = array<i64: 4, 128>}]} {
    %c0 = arith.constant 0 : index
    %c0_0 = arith.constant 0 : index
    %0 = vector.load %arg1[%c0, %c0_0] : memref<128x25xf32, #tpu.memory_space<vmem>>, vector<128x25xf32>
    %1 = tpu.transpose %0, [1, 0] : vector<128x25xf32> -> vector<25x128xf32>
    %2 = vector.extract_strided_slice %1 {offsets = [0, 0], sizes = [3, 128], strides = [1, 1]} : vector<25x128xf32> to vector<3x128xf32>
    %cst = arith.constant dense<0xFF800000> : vector<128xf32>
    %3 = vector.multi_reduction <maximumf>, %2, %cst [0] : vector<3x128xf32> to vector<128xf32>
    %4 = vector.shape_cast %3 : vector<128xf32> to vector<1x128xf32>
    %5 = vector.extract_strided_slice %1 {offsets = [5, 0], sizes = [3, 128], strides = [1, 1]} : vector<25x128xf32> to vector<3x128xf32>
    %cst_1 = arith.constant dense<0xFF800000> : vector<128xf32>
    %6 = vector.multi_reduction <maximumf>, %5, %cst_1 [0] : vector<3x128xf32> to vector<128xf32>
    %7 = vector.shape_cast %6 : vector<128xf32> to vector<1x128xf32>
    %8 = arith.maximumf %4, %7 : vector<1x128xf32>
    %9 = vector.extract_strided_slice %1 {offsets = [10, 0], sizes = [3, 128], strides = [1, 1]} : vector<25x128xf32> to vector<3x128xf32>
    %cst_2 = arith.constant dense<0xFF800000> : vector<128xf32>
    %10 = vector.multi_reduction <maximumf>, %9, %cst_2 [0] : vector<3x128xf32> to vector<128xf32>
    %11 = vector.shape_cast %10 : vector<128xf32> to vector<1x128xf32>
    %12 = arith.maximumf %8, %11 : vector<1x128xf32>
    %c0_3 = arith.constant 0 : index
    %c0_4 = arith.constant 0 : index
    %13 = vector.load %arg2[%c0_3, %c0_4] : memref<4x128xf32, #tpu.memory_space<vmem>>, vector<1x128xf32>
    tpu.vector_store %arg2[%c0_3, %c0_4], %12 {strides = array<i32>} : memref<4x128xf32, #tpu.memory_space<vmem>>, vector<1x128xf32>,
    %14 = vector.extract_strided_slice %1 {offsets = [3, 0], sizes = [2, 128], strides = [1, 1]} : vector<25x128xf32> to vector<2x128xf32>
    %cst_5 = arith.constant dense<0xFF800000> : vector<128xf32>
    %15 = vector.multi_reduction <maximumf>, %14, %cst_5 [0] : vector<2x128xf32> to vector<128xf32>
    %16 = vector.shape_cast %15 : vector<128xf32> to vector<1x128xf32>
    %17 = vector.extract_strided_slice %1 {offsets = [8, 0], sizes = [2, 128], strides = [1, 1]} : vector<25x128xf32> to vector<2x128xf32>
    %cst_6 = arith.constant dense<0xFF800000> : vector<128xf32>
    %18 = vector.multi_reduction <maximumf>, %17, %cst_6 [0] : vector<2x128xf32> to vector<128xf32>
    %19 = vector.shape_cast %18 : vector<128xf32> to vector<1x128xf32>
    %20 = arith.maximumf %16, %19 : vector<1x128xf32>
    %21 = vector.extract_strided_slice %1 {offsets = [13, 0], sizes = [2, 128], strides = [1, 1]} : vector<25x128xf32> to vector<2x128xf32>
    %cst_7 = arith.constant dense<0xFF800000> : vector<128xf32>
    %22 = vector.multi_reduction <maximumf>, %21, %cst_7 [0] : vector<2x128xf32> to vector<128xf32>
    %23 = vector.shape_cast %22 : vector<128xf32> to vector<1x128xf32>
    %24 = arith.maximumf %20, %23 : vector<1x128xf32>
    %c1 = arith.constant 1 : index
    %c0_8 = arith.constant 0 : index
    %25 = vector.load %arg2[%c1, %c0_8] : memref<4x128xf32, #tpu.memory_space<vmem>>, vector<1x128xf32>
    tpu.vector_store %arg2[%c1, %c0_8], %24 {strides = array<i32>} : memref<4x128xf32, #tpu.memory_space<vmem>>, vector<1x128xf32>,
    %26 = vector.extract_strided_slice %1 {offsets = [15, 0], sizes = [3, 128], strides = [1, 1]} : vector<25x128xf32> to vector<3x128xf32>
    %cst_9 = arith.constant dense<0xFF800000> : vector<128xf32>
    %27 = vector.multi_reduction <maximumf>, %26, %cst_9 [0] : vector<3x128xf32> to vector<128xf32>
    %28 = vector.shape_cast %27 : vector<128xf32> to vector<1x128xf32>
    %29 = vector.extract_strided_slice %1 {offsets = [20, 0], sizes = [3, 128], strides = [1, 1]} : vector<25x128xf32> to vector<3x128xf32>
    %cst_10 = arith.constant dense<0xFF800000> : vector<128xf32>
    %30 = vector.multi_reduction <maximumf>, %29, %cst_10 [0] : vector<3x128xf32> to vector<128xf32>
    %31 = vector.shape_cast %30 : vector<128xf32> to vector<1x128xf32>
    %32 = arith.maximumf %28, %31 : vector<1x128xf32>
    %c2 = arith.constant 2 : index
    %c0_11 = arith.constant 0 : index
    %33 = vector.load %arg2[%c2, %c0_11] : memref<4x128xf32, #tpu.memory_space<vmem>>, vector<1x128xf32>
    tpu.vector_store %arg2[%c2, %c0_11], %32 {strides = array<i32>} : memref<4x128xf32, #tpu.memory_space<vmem>>, vector<1x128xf32>,
    %34 = vector.extract_strided_slice %1 {offsets = [18, 0], sizes = [2, 128], strides = [1, 1]} : vector<25x128xf32> to vector<2x128xf32>
    %cst_12 = arith.constant dense<0xFF800000> : vector<128xf32>
    %35 = vector.multi_reduction <maximumf>, %34, %cst_12 [0] : vector<2x128xf32> to vector<128xf32>
    %36 = vector.shape_cast %35 : vector<128xf32> to vector<1x128xf32>
    %37 = vector.extract_strided_slice %1 {offsets = [23, 0], sizes = [2, 128], strides = [1, 1]} : vector<25x128xf32> to vector<2x128xf32>
    %cst_13 = arith.constant dense<0xFF800000> : vector<128xf32>
    %38 = vector.multi_reduction <maximumf>, %37, %cst_13 [0] : vector<2x128xf32> to vector<128xf32>
    %39 = vector.shape_cast %38 : vector<128xf32> to vector<1x128xf32>
    %40 = arith.maximumf %36, %39 : vector<1x128xf32>
    %c3 = arith.constant 3 : index
    %c0_14 = arith.constant 0 : index
    %41 = vector.load %arg2[%c3, %c0_14] : memref<4x128xf32, #tpu.memory_space<vmem>>, vector<1x128xf32>
    tpu.vector_store %arg2[%c3, %c0_14], %40 {strides = array<i32>} : memref<4x128xf32, #tpu.memory_space<vmem>>, vector<1x128xf32>,
    return
  }
  func.func @transform_0(%arg0: i32) -> (i32, i32) {
    %c0_i32 = arith.constant 0 : i32
    %c0_i32_0 = arith.constant 0 : i32
    return %arg0, %c0_i32 : i32, i32
  }
  func.func @transform_1(%arg0: i32) -> (i32, i32) {
    %c0_i32 = arith.constant 0 : i32
    %c0_i32_0 = arith.constant 0 : i32
    return %c0_i32, %arg0 : i32, i32
  }
}

</mosaic_0001>

<bundles_post_ra>
// kernel: tpu_custom_call.1
= control target key start
LH: loop header
LB: loop body
LE: loop exit
PB: predicated region body
PF: predicated region fallthrough
CT: control target
= control target key end

     0   :  { %6 = vsyncpa [#allocation3], 0  ;;  %s575_s0 = inlined_call_operand.vmem [shape: f32[512,25], index: 0, kind: input, shape index: {}]   ;;  %s576_s1 = inlined_call_operand.hbm [shape: f32[4,512], index: 1, kind: output, shape index: {}]  }
   0x1   :  { %8 = vsyncpa [#allocation3 + $0x1], 0  ;;  %s458_s6 = smov 0   ;;  %s460_s7 = smov 0  }
   0x2   :  { %s462_s8 = smov 0   ;;  %s464_s9 = smov 0  }
   0x3 LB: > { %s479_s10 = sadd.s32 4294967295, %s446_s9   ;;  %s334_s11 = sadd.s32 4294967294, %s446_s9   ;;  %s446_s9 = sphi %s464_s9, %s582_s9   ;;  %s442_s8 = sphi %s462_s8, %s581_s8   ;;  %s438_s7 = sphi %s460_s7, %s580_s7   ;;  %s434_s6 = sphi %s458_s6, %s579_s6  }
   0x4   : > { %s483_s12 = sadd.s32 1, %s446_s9   ;;  %s47_s13 = sadd.s32 1, %s442_s8 }
   0x5   : > { %s44_s14 = ssub.s32 %s446_s9, %s483_s12  ;;  %p57_p0 = scmp.ne.s32.totalorder %s442_s8, %s438_s7 }
   0x6   : > { %p45_p1 = scmp.eq.s32.totalorder %s44_s14, 0  ;;  %p58_p2 = scmp.eq.s32.totalorder %s479_s10, 3 }
   0x7   : > { %p63_p3 = scmp.ne.s32.totalorder %s438_s7, %s434_s6  ;;  %p64_p4 = scmp.eq.s32.totalorder %s334_s11, 3 }
   0x8   : > { %s494_s15 = scalar_select %p45_p1, %s442_s8, %s47_s13  }
   0x9   : > { %p496_p5 = por %p58_p2, %p57_p0  ;;  %p500_p6 = por %p64_p4, %p63_p3 }
   0xa   : > { %p337_p7 = scmp.ge.s32.totalorder %s446_s9, 1  ;;  %p91_p8 = scmp.lt.s32.totalorder %s446_s9, 5 }
   0xc   : > { %p92_p9 = pnand %p337_p7, %p91_p8 }
   0xd   : > { %s339_s18 = sshll.u32 (!%p92_p9), %s479_s10, 4  ;;  %s108_s23 = sand.u32 (!%p92_p9), 1, %s438_s7  }
   0xe   : > { %95 = sbr.rel (%p92_p9) target bundleno = 232 (0xe8), region = 24  ;;  %p112_p10 = scmp.lt.s32.totalorder (!%p92_p9), %s339_s18, 63 }
   0xf   : > { %s338_s24 = sshll.u32 (!%p92_p9), %s108_s23, 2  ;;  %s342_s26 = sshll.u32 (!%p92_p9), %s479_s10, 2 }
  0x10   : > { %s534_s25 = scalar_lea.vmem (!%p92_p9), [#allocation2], %s338_s24  ;;  %s270_s29 = scalar_lea.hbm (!%p92_p9), %s576_s1, %s342_s26 }
  0x11   : > { %s272_s30 = sshll.u32 (!%p92_p9), %s534_s25, 4  ;;  %s274_s2 = sshll.u32 (!%p92_p9), %s270_s29, 4  ;;  %s273_s30 = int_to_ptr.vmem [resolvable:$true] %s272_s30  ;;  %s275_s2 = int_to_ptr.hbm [resolvable:$true] %s274_s2 }
  0x12   : > { %s260_s3 = scalar_lea.sflag (!%p92_p9), [#allocation3], %s108_s23  ;;  %s398_s4 = sshra.s32 (!%p92_p9), %s275_s2, 4  ;;  %s399_s4 = int_to_ptr.hbm [resolvable:$true] %s398_s4 }
  0x13   : > { %s584_s18 = smov (!%p112_p10, %s339_s18), 63  ;;  %vm165_vm0 = vcmask 1042432   ;;  %vm173_vm1 = vcmask 1047557   ;;  %vm192_vm2 = vcmask 1044483   ;;  %vm182_vm3 = vcmask 1044482   ;;  %s400_s5 = scalar_lea.hbm %s399_s4, 4 }
  0x14   : > { %s340_s19 = sshll.u32 %s584_s18, 3  ;;  %vm200_vm4 = vcmask 1041408   ;;  %vm209_vm5 = vcmask 1046533   ;;  %vm219_vm6 = vcmask 1047559   ;;  %vm229_vm7 = vcmask 1046532   ;;  %p401_p11 = scmp.ne.s32.totalorder %s399_s4, %s400_s5 }
  0x15   : > { %s510_s22 = scalar_lea.vmem %s575_s0, %s340_s19  ;;  %vm239_vm8 = vcmask 1043458   ;;  %vm248_vm9 = vcmask 1040384   ;;  %s404_s13 = scalar_lea.hbm %s576_s1, 16 }
  0x16   : > { %v117_v0 = vld [vmem:[%s510_s22] sm:$0xff]  ;;  %v118_v1 = vld [vmem:[%s510_s22 + $0x8] sm:$0xff]  ;;  %v119_v2 = vld [vmem:[%s510_s22 + $0x10] sm:$0xff]  ;;  %p402_p12 = pnand %p401_p11, %p496_p5  ;;  %p405_p0 = scmp.lt.s32.totalorder %s399_s4, %s576_s1 }
  0x17   : > { %133 = vxpose.xlu0.b32.start [1/16] (narrow) %v117_v0, 32  ;;  %v120_v3 = vld [vmem:[%s510_s22 + $0x18] sm:$0xff]  ;;  %v121_v4 = vld [vmem:[%s510_s22 + $0x20] sm:$0xff]  ;;  %v122_v5 = vld [vmem:[%s510_s22 + $0x28] sm:$0xff]  ;;  %p406_p1 = scmp.lt.s32.totalorder %s404_s13, %s400_s5 }
  0x18   : > { %v123_v6 = vld [vmem:[%s510_s22 + $0x30] sm:$0xff]  ;;  %v124_v7 = vld [vmem:[%s510_s22 + $0x38] sm:$0xff]  ;;  %v125_v8 = vld [vmem:[%s510_s22 + $0x40] sm:$0xff]  ;;  %p403_p13 = pneg %p402_p12 }
  0x19   : > { %v126_v9 = vld [vmem:[%s510_s22 + $0x48] sm:$0xff]  ;;  %v127_v10 = vld [vmem:[%s510_s22 + $0x50] sm:$0xff]  ;;  %v128_v11 = vld [vmem:[%s510_s22 + $0x58] sm:$0xff]  ;;  %p407_p2 = por %p406_p1, %p405_p0 }
  0x1a   : > { %v129_v12 = vld [vmem:[%s510_s22 + $0x60] sm:$0xff]  ;;  %v130_v13 = vld [vmem:[%s510_s22 + $0x68] sm:$0xff]  ;;  %v131_v14 = vld [vmem:[%s510_s22 + $0x70] sm:$0xff] }
  0x1b   : > { %v132_v15 = vld [vmem:[%s510_s22 + $0x78] sm:$0xff]  ;;  %p408_p3 = pnand %p407_p2, %p403_p13 }
  0x1f   : > { %134 = vxpose.xlu0.b32.cont [2/16] (narrow) %v118_v1, 32 }
  0x27   : > { %135 = vxpose.xlu0.b32.cont [3/16] (narrow) %v119_v2, 32 }
  0x2f   : > { %136 = vxpose.xlu0.b32.cont [4/16] (narrow) %v120_v3, 32 }
  0x37   : > { %137 = vxpose.xlu0.b32.cont [5/16] (narrow) %v121_v4, 32 }
  0x3f   : > { %138 = vxpose.xlu0.b32.cont [6/16] (narrow) %v122_v5, 32 }
  0x47   : > { %139 = vxpose.xlu0.b32.cont [7/16] (narrow) %v123_v6, 32 }
  0x4f   : > { %140 = vxpose.xlu0.b32.cont [8/16] (narrow) %v124_v7, 32 }
  0x57   : > { %141 = vxpose.xlu0.b32.cont [9/16] (narrow) %v125_v8, 32 }
  0x5f   : > { %142 = vxpose.xlu0.b32.cont [10/16] (narrow) %v126_v9, 32 }
  0x67   : > { %143 = vxpose.xlu0.b32.cont [11/16] (narrow) %v127_v10, 32 }
  0x6f   : > { %144 = vxpose.xlu0.b32.cont [12/16] (narrow) %v128_v11, 32 }
  0x77   : > { %145 = vxpose.xlu0.b32.cont [13/16] (narrow) %v129_v12, 32 }
  0x7f   : > { %146 = vxpose.xlu0.b32.cont [14/16] (narrow) %v130_v13, 32 }
  0x87   : > { %147 = vxpose.xlu0.b32.cont [15/16] (narrow) %v131_v14, 32 }
  0x8f   : > { %148 = vxpose.xlu0.b32.end [16/16] (narrow) %v132_v15, 32 }
  0xbb   : > { %v149_v16 = vpop.trf.xlu0 }
  0xbc   : > { %v166_v17 = vsel %vm165_vm0, %v149_v16, -inf  ;;  %v174_v18 = vsel %vm173_vm1, %v149_v16, -inf  ;;  %v193_v19 = vsel %vm192_vm2, %v149_v16, -inf }
  0xbd   : > { %v167_v20 = vrot.slane %v166_v17, 4  ;;  %v175_v21 = vrot.slane %v174_v18, 4  ;;  %v194_v22 = vrot.slane %v193_v19, 4 }
  0xbf   : > { %v168_v23 = vmax.f32 %v166_v17, %v167_v20  ;;  %v176_v24 = vmax.f32 %v174_v18, %v175_v21  ;;  %v195_v25 = vmax.f32 %v193_v19, %v194_v22 }
  0xc1   : > { %v169_v26 = vrot.slane %v168_v23, 2  ;;  %v177_v27 = vrot.slane %v176_v24, 2  ;;  %v196_v30 = vrot.slane %v195_v25, 2 }
  0xc3   : > { %v170_v28 = vmax.f32 %v168_v23, %v169_v26  ;;  %v178_v29 = vmax.f32 %v176_v24, %v177_v27  ;;  %v150_v31 = vpop.trf.xlu0  ;;  %v197_v40 = vmax.f32 %v195_v25, %v196_v30 }
  0xc4   : > { %v183_v32 = vsel %vm182_vm3, %v150_v31, -inf  ;;  %v201_v33 = vsel %vm200_vm4, %v150_v31, -inf  ;;  %v210_v34 = vsel %vm209_vm5, %v150_v31, -inf  ;;  %v220_v47 = vsel %vm219_vm6, %v150_v31, -inf }
  0xc5   : > { %v184_v35 = vrot.slane %v183_v32, 4  ;;  %v202_v36 = vrot.slane %v201_v33, 4  ;;  %v211_v37 = vrot.slane %v210_v34, 4  ;;  %v171_v38 = vrot.slane %v170_v28, 1 }
  0xc6   : > { %v179_v39 = vrot.slane %v178_v29, 1  ;;  %v198_v50 = vrot.slane %v197_v40, 1 }
  0xc7   : > { %v185_v41 = vmax.f32 %v183_v32, %v184_v35  ;;  %v203_v42 = vmax.f32 %v201_v33, %v202_v36  ;;  %v212_v43 = vmax.f32 %v210_v34, %v211_v37  ;;  %v172_v48 = vmax.f32 %v170_v28, %v171_v38 }
  0xc8   : > { %v180_v49 = vmax.f32 %v178_v29, %v179_v39  ;;  %v199_v4 = vmax.f32 %v197_v40, %v198_v50 }
  0xc9   : > { %v186_v44 = vrot.slane %v185_v41, 2  ;;  %v204_v45 = vrot.slane %v203_v42, 2  ;;  %v213_v46 = vrot.slane %v212_v43, 2 }
  0xca   : > { %v181_v0 = vmax.f32 %v172_v48, %v180_v49 }
  0xcb   : > { %v187_v51 = vmax.f32 %v185_v41, %v186_v44  ;;  %v151_v52 = vpop.trf.xlu0  ;;  %v205_v53 = vmax.f32 %v203_v42, %v204_v45  ;;  %v214_v54 = vmax.f32 %v212_v43, %v213_v46 }
  0xcc   : > { %v221_v55 = vsel %vm200_vm4, %v151_v52, -inf  ;;  %v230_v56 = vsel %vm229_vm7, %v151_v52, -inf  ;;  %v240_v59 = vsel %vm239_vm8, %v151_v52, -inf  ;;  %v247_v16 = vsel %vm219_vm6, %v151_v52, -inf }
  0xcd   : > { %v188_v57 = vrot.slane %v187_v51, 1  ;;  %v231_v58 = vrot.slane %v230_v56, 4  ;;  %v222_v60 = vmax.f32 %v220_v47, %v221_v55  ;;  %v206_v61 = vrot.slane %v205_v53, 1 }
  0xce   : > { %v215_v62 = vrot.slane %v214_v54, 1  ;;  %v241_v63 = vrot.slane %v240_v59, 4 }
  0xcf   : > { %v189_v1 = vmax.f32 %v187_v51, %v188_v57  ;;  %v232_v2 = vmax.f32 %v230_v56, %v231_v58  ;;  %v223_v3 = vrot.slane %v222_v60, 4  ;;  %v207_v5 = vmax.f32 %v205_v53, %v206_v61 }
  0xd0   : > { %v242_v8 = vmax.f32 %v240_v59, %v241_v63  ;;  %v216_v11 = vmax.f32 %v214_v54, %v215_v62 }
  0xd1   : > { %v190_v6 = vmax.f32 %v181_v0, %v189_v1  ;;  %v233_v7 = vrot.slane %v232_v2, 2  ;;  %v224_v9 = vmax.f32 %v222_v60, %v223_v3  ;;  %v208_v10 = vmax.f32 %v199_v4, %v207_v5 }
  0xd2   : > { %v243_v19 = vrot.slane %v242_v8, 2 }
  0xd3   : > { %v234_v12 = vmax.f32 %v232_v2, %v233_v7  ;;  %v152_v13 = vpop.trf.xlu0  ;;  %v225_v14 = vrot.slane %v224_v9, 2  ;;  %191 = vst [vmem:[%s534_s25] sm:$0x1] %v190_v6  ;;  %v217_v15 = vmax.f32 %v208_v10, %v216_v11 }
  0xd4   : > { %v249_v17 = vsel %vm248_vm9, %v152_v13, -inf  ;;  %v244_v25 = vmax.f32 %v242_v8, %v243_v19 }
  0xd5   : > { %v235_v18 = vrot.slane %v234_v12, 1  ;;  %v226_v20 = vmax.f32 %v224_v9, %v225_v14  ;;  %v250_v21 = vmax.f32 %v247_v16, %v249_v17  ;;  %218 = vst [vmem:[%s534_s25 + $0x1] sm:$0x1] %v217_v15 }
  0xd6   : > { %v245_v30 = vrot.slane %v244_v25, 1 }
  0xd7   : > { %v227_v22 = vrot.slane %v226_v20, 1  ;;  %v251_v23 = vrot.slane %v250_v21, 4  ;;  %v236_v24 = vmax.f32 %v234_v12, %v235_v18 }
  0xd8   : > { %v246_v33 = vmax.f32 %v244_v25, %v245_v30 }
  0xd9   : > { %v228_v26 = vmax.f32 %v226_v20, %v227_v22  ;;  %v252_v27 = vmax.f32 %v250_v21, %v251_v23 }
  0xdb   : > { %v237_v28 = vmax.f32 %v228_v26, %v236_v24  ;;  %v253_v29 = vrot.slane %v252_v27, 2 }
  0xdd   : > { %v254_v31 = vmax.f32 %v252_v27, %v253_v29  ;;  %238 = vst [vmem:[%s534_s25 + $0x2] sm:$0x1] %v237_v28 }
  0xdf   : > { %v255_v32 = vrot.slane %v254_v31, 1 }
  0xe1   : > { %v256_v34 = vmax.f32 %v254_v31, %v255_v32 }
  0xe3   : > { %v257_v35 = vmax.f32 %v246_v33, %v256_v34 }
  0xe5   : > { %258 = vst [vmem:[%s534_s25 + $0x3] sm:$0x1] %v257_v35 }
  0xe6   : > { %411 = shalt.err (!%p408_p3)
}
  0xe7   : > { %345 = dma.vmem_to_hbm [thread:$0]  (%p496_p5), %s273_s30, 64, %s275_s2, %s260_s3  }
  0xe8 PF: > { %p351_p4 = scmp.ge.s32.totalorder %s446_s9, 2  ;;  %s286_s19 = sand.u32 1, %s434_s6  }
  0xe9   : > { %s287_s20 = scalar_lea.sflag [#allocation3], %s286_s19 }
  0xea   : > { %p348_p7 = pnand %p351_p4, %p500_p6 }
  0xec   : > { %p349_p8 = pneg %p348_p7 }
  0xee   : > { %429 = dma.done.wait (%p349_p8), %s287_s20, 64  }
  0xef   : > { %431 = vsyncadd (%p349_p8), %s287_s20, 4294967232  ;;  %p11_p9 = scmp.ge.s32.totalorder %s483_s12, 6   ;;  %s579_s6 = smov %s438_s7 }
  0xf0   : > { %s580_s7 = smov %s442_s8  ;;  %s581_s8 = smov %s494_s15 }
  0xf1   : > { %s582_s9 = smov %s483_s12  ;;  %13 = sbr.rel (!%p11_p9) target bundleno = 3 (0x3), region = 59 }
  0xf6   :  { %293 = vsyncpa [#allocation3], 1 }
  0xf7   :  { %295 = vsyncpa [#allocation3 + $0x1], 1 }

</bundles_post_ra>
